<compile_context>
chip_gen: v5e
topology: v5e:2x2
jax: 0.10.0
libtpu: 0.0.40
codegen_flags: <defaults>
</compile_context>

<pallas_src>
import jax
import jax.numpy as jnp
from jax.experimental import pallas as pl
from jax.experimental.pallas import tpu as pltpu

_LANE = 128
_SUBLANE = 8
# ~2 MiB per block; with double-buffered input + output blocks this is ~8 MiB
# of VMEM, safe on v5e (16 MiB scoped default), v6e (32 MiB) and v7x (64 MiB phys).
_TARGET_TILE_BYTES = 2 * 1024 * 1024
_VMEM_LIMIT_BYTES = 32 * 1024 * 1024


def _copy_kernel(x_ref, o_ref):
    # Identity: output tile = input tile.
    o_ref[...] = x_ref[...]


def _lane_dense_2d(total):
    """Pick a (rows, cols) factorization with cols a multiple of 128.

    Prefer a factorization whose row count is sublane-aligned (multiple of 8)
    so the row axis can be tiled; otherwise return the widest legal view.
    """
    best = None
    for cols in (4096, 2048, 1024, 512, 256, _LANE):
        if total % cols == 0:
            rows = total // cols
            if best is None:
                best = (rows, cols)
            if rows % _SUBLANE == 0:
                return rows, cols
    return best


def identity(x, *, short_circuit=False):
    """Identity.forward.

    short_circuit=True is the zero-cost production path recommended by the
    perf review (no custom call, no HBM traffic, no launch overhead).  The
    default path runs a lane-dense tiled Pallas copy kernel so the kernel is
    actually exercised on TPU.
    """
    if short_circuit or x.size == 0:
        return x

    total = int(x.size)
    itemsize = jnp.dtype(x.dtype).itemsize
    nbytes = total * itemsize
    cost = pl.CostEstimate(flops=0, transcendentals=0, bytes_accessed=2 * nbytes)

    shape2d = _lane_dense_2d(total)
    if shape2d is None:
        # TODO(synk): sizes not divisible by 128 fall back to a single
        # full-array block (always legal); pad/tile manually for huge inputs.
        return pl.pallas_call(
            _copy_kernel,
            out_shape=jax.ShapeDtypeStruct(x.shape, x.dtype),
            cost_estimate=cost,
            compiler_params=pltpu.CompilerParams(
                vmem_limit_bytes=_VMEM_LIMIT_BYTES),
        )(x)

    rows, cols = shape2d
    x2 = x.reshape(rows, cols)

    if rows % _SUBLANE != 0:
        # Single full block: block_shape == array shape is always legal.
        y2 = pl.pallas_call(
            _copy_kernel,
            out_shape=jax.ShapeDtypeStruct((rows, cols), x.dtype),
            cost_estimate=cost,
            compiler_params=pltpu.CompilerParams(
                vmem_limit_bytes=_VMEM_LIMIT_BYTES),
        )(x2)
        return y2.reshape(x.shape)

    # Sublane-aligned row tiles, ~_TARGET_TILE_BYTES per block.
    block_rows = max(
        _SUBLANE,
        (_TARGET_TILE_BYTES // (cols * itemsize)) // _SUBLANE * _SUBLANE,
    )
    block_rows = min(rows, block_rows)
    while rows % block_rows != 0:
        block_rows -= _SUBLANE  # terminates: rows % _SUBLANE == 0

    grid = (rows // block_rows,)
    y2 = pl.pallas_call(
        _copy_kernel,
        out_shape=jax.ShapeDtypeStruct((rows, cols), x.dtype),
        grid=grid,
        in_specs=[pl.BlockSpec((block_rows, cols), lambda i: (i, 0))],
        out_specs=pl.BlockSpec((block_rows, cols), lambda i: (i, 0)),
        compiler_params=pltpu.CompilerParams(
            dimension_semantics=("arbitrary",),
            vmem_limit_bytes=_VMEM_LIMIT_BYTES,
        ),
        cost_estimate=cost,
    )(x2)
    return y2.reshape(x.shape)


if __name__ == "__main__":
    key = jax.random.PRNGKey(0)
    # Small NCHW-like input consistent with a typical forward call.
    x = jax.random.normal(key, (2, 4, 16, 16), dtype=jnp.float32)

    # Pallas kernel path.
    y = identity(x)
    jax.block_until_ready(y)
    assert y.shape == x.shape and y.dtype == x.dtype
    assert bool(jnp.all(y == x))

    # Zero-cost production path (per perf review): no kernel at all.
    y_fast = identity(x, short_circuit=True)
    assert y_fast is x

    print("KERNEL_OK")
</pallas_src>

<mosaic_0001>
module attributes {stable_mosaic.version = 11 : i64} {
  func.func @_copy_kernel(%arg0: i32, %arg1: memref<8x256xf32, #tpu.memory_space<vmem>>, %arg2: memref<8x256xf32, #tpu.memory_space<vmem>>) attributes {dimension_semantics = [#tpu.dimension_semantics<arbitrary>], iteration_bounds = array<i64: 1>, scalar_prefetch = 0 : i64, scratch_operands = 0 : i64, tpu.core_type = #tpu.core_type<tc>, window_params = [{transform_indices = @transform_0, window_bounds = array<i64: 8, 256>}, {transform_indices = @transform_1, window_bounds = array<i64: 8, 256>}]} {
    %c0 = arith.constant 0 : index
    %c0_0 = arith.constant 0 : index
    %0 = vector.load %arg1[%c0, %c0_0] : memref<8x256xf32, #tpu.memory_space<vmem>>, vector<8x256xf32>
    %c0_1 = arith.constant 0 : index
    %c0_2 = arith.constant 0 : index
    %1 = vector.load %arg2[%c0_1, %c0_2] : memref<8x256xf32, #tpu.memory_space<vmem>>, vector<8x256xf32>
    tpu.vector_store %arg2[%c0_1, %c0_2], %0 {strides = array<i32>} : memref<8x256xf32, #tpu.memory_space<vmem>>, vector<8x256xf32>,
    return
  }
  func.func @transform_0(%arg0: i32) -> (i32, i32) {
    %c0_i32 = arith.constant 0 : i32
    %c0_i32_0 = arith.constant 0 : i32
    return %arg0, %c0_i32 : i32, i32
  }
  func.func @transform_1(%arg0: i32) -> (i32, i32) {
    %c0_i32 = arith.constant 0 : i32
    %c0_i32_0 = arith.constant 0 : i32
    return %arg0, %c0_i32 : i32, i32
  }
}

</mosaic_0001>

<bundles_post_ra>
// kernel: tpu_custom_call.1
= control target key start
LH: loop header
LB: loop body
LE: loop exit
PB: predicated region body
PF: predicated region fallthrough
CT: control target
= control target key end

     0   :  { %6 = vsyncpa [#allocation3], 0  ;;  %s116_s0 = inlined_call_operand.hbm [shape: f32[8,256], index: 0, kind: input, shape index: {}]   ;;  %s117_s1 = inlined_call_operand.hbm [shape: f32[8,256], index: 1, kind: output, shape index: {}]  }
   0x1   :  { %7 = vsyncpa [#allocation4], 0  ;;  %s13_s8 = sshll.u32 %s116_s0, 4  ;;  %s98_s9 = smov [#allocation2]   ;;  %s14_s8 = int_to_ptr.hbm [resolvable:$true] %s13_s8 }
   0x2   :  { %s15_s10 = sshll.u32 %s98_s9, 4  ;;  %s16_s10 = int_to_ptr.vmem [resolvable:$true] %s15_s10 }
   0x3   :  { %18 = dma.hbm_to_vmem [thread:$0]  %s14_s8, 256, %s16_s10, [#allocation3]  }
   0x4   :  { %94 = dma.done.wait [#allocation3], 256  }
   0x5   :  { %95 = vsyncadd [#allocation3], 4294967040  ;;  %s99_s11 = smov [#allocation5]   ;;  %s34_s15 = sshll.u32 %s117_s1, 4  ;;  %v23_v0 = vld [vmem:[#allocation2] sm:$0xff]  ;;  %v24_v1 = vld [vmem:[#allocation2 + $0x8] sm:$0xff]  ;;  %s35_s15 = int_to_ptr.hbm [resolvable:$true] %s34_s15 }
   0x6   :  { %s32_s12 = sshll.u32 %s99_s11, 4  ;;  %25 = vst [vmem:[#allocation5] sm:$0xff] %v23_v0  ;;  %s33_s12 = int_to_ptr.vmem [resolvable:$true] %s32_s12 }
   0x7   :  { %26 = vst [vmem:[#allocation5 + $0x8] sm:$0xff] %v24_v1 }
   0x8   :  { %37 = dma.vmem_to_hbm [thread:$0]  %s33_s12, 256, %s35_s15, [#allocation4]  }
   0x9   :  { %96 = dma.done.wait [#allocation4], 256  }
   0xa   :  { %97 = vsyncadd [#allocation4], 4294967040 }
   0xb   :  { %42 = vsyncpa [#allocation3], 1 }
   0xc   :  { %43 = vsyncpa [#allocation4], 1 }

</bundles_post_ra>
